<compile_context>
chip_gen: v7x
topology: tpu7x:2x2x1
jax: 0.10.0
libtpu: 0.0.40
codegen_flags: <defaults>
</compile_context>

<pallas_src>
import functools

import jax
import jax.numpy as jnp
from jax.experimental import pallas as pl
from jax.experimental.pallas import tpu as pltpu


def _round_up(x, m):
    return ((x + m - 1) // m) * m


def _disalign_kernel(conf_col,
                     x_ref, w_feat_ref, b_feat_ref,
                     w_fc_ref, b_fc_ref, scale_ref, bias_ref,
                     out_ref, acc_ref):
    k = pl.program_id(1)

    @pl.when(k == 0)
    def _init():
        acc_ref[...] = jnp.zeros_like(acc_ref)

    # Feature GEMM, accumulated over the D (K) axis: (tm, tk) @ (tk, Fp) -> f32
    acc_ref[...] += jnp.dot(x_ref[...], w_feat_ref[...],
                            preferred_element_type=jnp.float32)

    @pl.when(k == pl.num_programs(1) - 1)
    def _finalize():
        # feats = backbone features (bias added once, in the epilogue only).
        feats = acc_ref[...] + b_feat_ref[...]                      # (tm, Fp) f32

        # Augmented classifier: columns [0, C) = fc logits, column C = conf
        # logit (the folded confidence_layer), remaining columns = padding.
        aug = jnp.dot(feats.astype(jnp.bfloat16), w_fc_ref[...],
                      preferred_element_type=jnp.float32) + b_fc_ref[...]  # (tm, Np)

        # Extract the confidence-logit column via a masked lane reduction
        # (robust lowering for a non-128-aligned single-lane extract).
        lane_ids = jax.lax.broadcasted_iota(jnp.int32, aug.shape, dimension=1)
        conf_logit = jnp.sum(jnp.where(lane_ids == conf_col, aug, 0.0),
                             axis=1, keepdims=True)                 # (tm, 1)
        conf = jax.nn.sigmoid(conf_logit)

        # DisAlign re-calibration; padded columns carry zero scale/bias and are
        # sliced off in the wrapper.
        out_ref[...] = ((1.0 + conf * scale_ref[...]) * aug
                        + conf * bias_ref[...]).astype(out_ref.dtype)


@jax.jit
def disalign_forward(x_nchw, params):
    """Fused DisAlign forward. Returns {'logits': (B, num_classes)} (fp32)."""
    B = x_nchw.shape[0]
    x_flat = x_nchw.reshape(B, -1)                 # torch.flatten(x, 1) layout
    D = x_flat.shape[1]

    w_feat = params["w_feat"]                      # (D, F)
    b_feat = params["b_feat"]                      # (1, F)
    w_fc = params["w_fc"]                          # (F, C)
    b_fc = params["b_fc"]                          # (1, C)
    w_conf = params["w_conf"]                      # (F, 1)
    b_conf = params["b_conf"]                      # (1, 1)
    scale = params["logit_scale"]                  # (1, C)
    bias = params["logit_bias"]                    # (1, C)

    F_dim = w_feat.shape[1]
    C = w_fc.shape[1]

    # ---- tiled / padded geometry (sized against v7x's 64 MiB VMEM) --------
    TM_MAX, TK_MAX = 256, 512
    tm = min(TM_MAX, _round_up(B, 8))
    tk = min(TK_MAX, _round_up(D, 128))
    Bp = _round_up(B, tm)
    Dp = _round_up(D, tk)
    Fp = _round_up(F_dim, 128)
    Np = _round_up(C + 1, 128)       # fc columns + fused confidence column
    conf_col = C                     # lane index of the confidence logit

    # ---- operand packing: bf16 MXU inputs, fp32 epilogue params ------------
    x_p = jnp.zeros((Bp, Dp), jnp.bfloat16).at[:B, :D].set(
        x_flat.astype(jnp.bfloat16))
    w_feat_p = jnp.zeros((Dp, Fp), jnp.bfloat16).at[:D, :F_dim].set(
        w_feat.astype(jnp.bfloat16))
    b_feat_p = jnp.zeros((1, Fp), jnp.float32).at[:, :F_dim].set(
        b_feat.astype(jnp.float32))

    w_fc_aug = jnp.concatenate([w_fc, w_conf], axis=1)              # (F, C+1)
    b_fc_aug = jnp.concatenate([b_fc, b_conf], axis=1)              # (1, C+1)
    w_fc_p = jnp.zeros((Fp, Np), jnp.bfloat16).at[:F_dim, :C + 1].set(
        w_fc_aug.astype(jnp.bfloat16))
    b_fc_p = jnp.zeros((1, Np), jnp.float32).at[:, :C + 1].set(
        b_fc_aug.astype(jnp.float32))
    scale_p = jnp.zeros((1, Np), jnp.float32).at[:, :C].set(
        scale.astype(jnp.float32))
    bias_p = jnp.zeros((1, Np), jnp.float32).at[:, :C].set(
        bias.astype(jnp.float32))

    grid = (Bp // tm, Dp // tk)

    cost = pl.CostEstimate(
        flops=2 * Bp * Dp * Fp + 2 * Bp * Fp * Np,
        transcendentals=Bp,
        bytes_accessed=(x_p.size * 2 + w_feat_p.size * 2 + w_fc_p.size * 2
                        + (b_feat_p.size + b_fc_p.size + scale_p.size
                           + bias_p.size) * 4
                        + Bp * Np * 4),
    )

    out_p = pl.pallas_call(
        functools.partial(_disalign_kernel, conf_col),
        out_shape=jax.ShapeDtypeStruct((Bp, Np), jnp.float32),
        grid_spec=pltpu.PrefetchScalarGridSpec(
            num_scalar_prefetch=0,
            grid=grid,
            in_specs=[
                pl.BlockSpec((tm, tk), lambda i, k: (i, k)),   # x slab
                pl.BlockSpec((tk, Fp), lambda i, k: (k, 0)),   # w_feat slab
                pl.BlockSpec((1, Fp), lambda i, k: (0, 0)),    # b_feat
                pl.BlockSpec((Fp, Np), lambda i, k: (0, 0)),   # w_fc (+conf col)
                pl.BlockSpec((1, Np), lambda i, k: (0, 0)),    # b_fc (+conf bias)
                pl.BlockSpec((1, Np), lambda i, k: (0, 0)),    # logit_scale
                pl.BlockSpec((1, Np), lambda i, k: (0, 0)),    # logit_bias
            ],
            out_specs=pl.BlockSpec((tm, Np), lambda i, k: (i, 0)),
            scratch_shapes=[pltpu.VMEM((tm, Fp), jnp.float32)],
        ),
        compiler_params=pltpu.CompilerParams(
            dimension_semantics=("parallel", "arbitrary")),
        cost_estimate=cost,
    )(x_p, w_feat_p, b_feat_p, w_fc_p, b_fc_p, scale_p, bias_p)

    return {"logits": out_p[:B, :C]}


def init_params(key, in_dim, num_features, num_classes):
    """Deterministic synthetic parameters (shapes as implied by the module)."""
    k1, k2, k3 = jax.random.split(key, 3)
    return {
        # synthetic backbone feature extractor: Linear(in_dim, num_features)
        "w_feat": (jax.random.normal(k1, (in_dim, num_features), jnp.float32)
                   * (1.0 / jnp.sqrt(in_dim))),
        "b_feat": jnp.zeros((1, num_features), jnp.float32),
        # synthetic backbone fc head: Linear(num_features, num_classes)
        "w_fc": (jax.random.normal(k2, (num_features, num_classes), jnp.float32)
                 * (1.0 / jnp.sqrt(num_features))),
        "b_fc": jnp.zeros((1, num_classes), jnp.float32),
        # confidence_layer = nn.Linear(num_features, 1)
        "w_conf": (jax.random.normal(k3, (num_features, 1), jnp.float32)
                   * (1.0 / jnp.sqrt(num_features))),
        "b_conf": jnp.zeros((1, 1), jnp.float32),
        # logit_scale = ones(1, num_classes); logit_bias = zeros(1, num_classes)
        "logit_scale": jnp.ones((1, num_classes), jnp.float32),
        "logit_bias": jnp.zeros((1, num_classes), jnp.float32),
    }


def _reference(x_nchw, params):
    """Pure-JAX reference (same bf16 matmul inputs / f32 accumulation)."""
    B = x_nchw.shape[0]
    x = x_nchw.reshape(B, -1).astype(jnp.bfloat16)
    feats = jnp.dot(x, params["w_feat"].astype(jnp.bfloat16),
                    preferred_element_type=jnp.float32) + params["b_feat"]
    feats_bf = feats.astype(jnp.bfloat16)
    logits = jnp.dot(feats_bf, params["w_fc"].astype(jnp.bfloat16),
                     preferred_element_type=jnp.float32) + params["b_fc"]
    conf = jax.nn.sigmoid(
        jnp.dot(feats_bf, params["w_conf"].astype(jnp.bfloat16),
                preferred_element_type=jnp.float32) + params["b_conf"])
    return (1.0 + conf * params["logit_scale"]) * logits + conf * params["logit_bias"]


if __name__ == "__main__":
    key = jax.random.PRNGKey(0)
    k_x, k_p = jax.random.split(key)

    B, Cin, H, W = 2, 4, 16, 16          # NCHW input, small shapes
    num_features = 32
    num_classes = 10
    in_dim = Cin * H * W                  # 1024

    x = jax.random.normal(k_x, (B, Cin, H, W), jnp.float32)
    params = init_params(k_p, in_dim, num_features, num_classes)

    out = disalign_forward(x, params)
    logits = jax.block_until_ready(out["logits"])

    ref = _reference(x, params)
    assert logits.shape == (B, num_classes)
    assert jnp.allclose(logits, ref, atol=2e-2, rtol=2e-2), "mismatch vs reference"

    print("KERNEL_OK")
</pallas_src>

<mosaic_0001>
module attributes {stable_mosaic.version = 11 : i64} {
  func.func @_disalign_kernel(%arg0: i32, %arg1: i32, %arg2: memref<8x512xbf16, #tpu.memory_space<vmem>>, %arg3: memref<512x128xbf16, #tpu.memory_space<vmem>>, %arg4: memref<1x128xf32, #tpu.memory_space<vmem>>, %arg5: memref<128x128xbf16, #tpu.memory_space<vmem>>, %arg6: memref<1x128xf32, #tpu.memory_space<vmem>>, %arg7: memref<1x128xf32, #tpu.memory_space<vmem>>, %arg8: memref<1x128xf32, #tpu.memory_space<vmem>>, %arg9: memref<8x128xf32, #tpu.memory_space<vmem>>, %arg10: memref<8x128xf32, #tpu.memory_space<vmem>>) attributes {dimension_semantics = [#tpu.dimension_semantics<parallel>, #tpu.dimension_semantics<arbitrary>], iteration_bounds = array<i64: 1, 2>, scalar_prefetch = 0 : i64, scratch_operands = 1 : i64, tpu.core_type = #tpu.core_type<tc>, window_params = [{transform_indices = @transform_0, window_bounds = array<i64: 8, 512>}, {transform_indices = @transform_1, window_bounds = array<i64: 512, 128>}, {pipeline_mode = #tpu.pipeline_mode<synchronous>, transform_indices = @transform_2, window_bounds = array<i64: 1, 128>}, {pipeline_mode = #tpu.pipeline_mode<synchronous>, transform_indices = @transform_3, window_bounds = array<i64: 128, 128>}, {pipeline_mode = #tpu.pipeline_mode<synchronous>, transform_indices = @transform_4, window_bounds = array<i64: 1, 128>}, {pipeline_mode = #tpu.pipeline_mode<synchronous>, transform_indices = @transform_5, window_bounds = array<i64: 1, 128>}, {pipeline_mode = #tpu.pipeline_mode<synchronous>, transform_indices = @transform_6, window_bounds = array<i64: 1, 128>}, {transform_indices = @transform_7, window_bounds = array<i64: 8, 128>}]} {
    %c0_i32 = arith.constant 0 : i32
    %0 = arith.cmpi eq, %arg1, %c0_i32 : i32
    %1 = arith.extui %0 : i1 to i32
    %c0_i32_0 = arith.constant 0 : i32
    %2 = arith.cmpi ne, %1, %c0_i32_0 : i32
    scf.if %2 {
      %cst_9 = arith.constant 0.000000e+00 : f32
      %12 = vector.broadcast %cst_9 : f32 to vector<8x128xf32>
      %c0_10 = arith.constant 0 : index
      %c0_11 = arith.constant 0 : index
      %13 = vector.load %arg10[%c0_10, %c0_11] : memref<8x128xf32, #tpu.memory_space<vmem>>, vector<8x128xf32>
      tpu.vector_store %arg10[%c0_10, %c0_11], %12 {strides = array<i32>} : memref<8x128xf32, #tpu.memory_space<vmem>>, vector<8x128xf32>,
    } else {
    }
    %c0 = arith.constant 0 : index
    %c0_1 = arith.constant 0 : index
    %3 = vector.load %arg10[%c0, %c0_1] : memref<8x128xf32, #tpu.memory_space<vmem>>, vector<8x128xf32>
    %c0_2 = arith.constant 0 : index
    %c0_3 = arith.constant 0 : index
    %4 = vector.load %arg2[%c0_2, %c0_3] : memref<8x512xbf16, #tpu.memory_space<vmem>>, vector<8x512xbf16>
    %c0_4 = arith.constant 0 : index
    %c0_5 = arith.constant 0 : index
    %5 = vector.load %arg3[%c0_4, %c0_5] : memref<512x128xbf16, #tpu.memory_space<vmem>>, vector<512x128xbf16>
    %cst = arith.constant dense<0.000000e+00> : vector<8x128xf32>
    %6 = tpu.matmul %4, %5, %cst {dimension_numbers = #tpu.dot_dimension_numbers<[1], [0], [0], [1], [0, 0, 1, 1], [], []>} : vector<8x512xbf16>, vector<512x128xbf16>, vector<8x128xf32> -> vector<8x128xf32>
    %7 = arith.addf %3, %6 : vector<8x128xf32>
    %c0_6 = arith.constant 0 : index
    %c0_7 = arith.constant 0 : index
    %8 = vector.load %arg10[%c0_6, %c0_7] : memref<8x128xf32, #tpu.memory_space<vmem>>, vector<8x128xf32>
    tpu.vector_store %arg10[%c0_6, %c0_7], %7 {strides = array<i32>} : memref<8x128xf32, #tpu.memory_space<vmem>>, vector<8x128xf32>,
    %c1_i32 = arith.constant 1 : i32
    %9 = arith.cmpi eq, %arg1, %c1_i32 : i32
    %10 = arith.extui %9 : i1 to i32
    %c0_i32_8 = arith.constant 0 : i32
    %11 = arith.cmpi ne, %10, %c0_i32_8 : i32
    scf.if %11 {
      %c0_9 = arith.constant 0 : index
      %c0_10 = arith.constant 0 : index
      %12 = vector.load %arg10[%c0_9, %c0_10] : memref<8x128xf32, #tpu.memory_space<vmem>>, vector<8x128xf32>
      %c0_11 = arith.constant 0 : index
      %c0_12 = arith.constant 0 : index
      %13 = vector.load %arg4[%c0_11, %c0_12] : memref<1x128xf32, #tpu.memory_space<vmem>>, vector<1x128xf32>
      %14 = vector.broadcast %13 : vector<1x128xf32> to vector<8x128xf32>
      %15 = arith.addf %12, %14 : vector<8x128xf32>
      %16 = arith.truncf %15 : vector<8x128xf32> to vector<8x128xbf16>
      %c0_13 = arith.constant 0 : index
      %c0_14 = arith.constant 0 : index
      %17 = vector.load %arg5[%c0_13, %c0_14] : memref<128x128xbf16, #tpu.memory_space<vmem>>, vector<128x128xbf16>
      %cst_15 = arith.constant dense<0.000000e+00> : vector<8x128xf32>
      %18 = tpu.matmul %16, %17, %cst_15 {dimension_numbers = #tpu.dot_dimension_numbers<[1], [0], [0], [1], [0, 0, 1, 1], [], []>} : vector<8x128xbf16>, vector<128x128xbf16>, vector<8x128xf32> -> vector<8x128xf32>
      %c0_16 = arith.constant 0 : index
      %c0_17 = arith.constant 0 : index
      %19 = vector.load %arg6[%c0_16, %c0_17] : memref<1x128xf32, #tpu.memory_space<vmem>>, vector<1x128xf32>
      %20 = vector.broadcast %19 : vector<1x128xf32> to vector<8x128xf32>
      %21 = arith.addf %18, %20 : vector<8x128xf32>
      %22 = tpu.iota {dimensions = array<i32: 1>} : vector<8x128xi32>
      %c10_i32 = arith.constant 10 : i32
      %23 = vector.broadcast %c10_i32 : i32 to vector<8x128xi32>
      %24 = arith.cmpi eq, %22, %23 : vector<8x128xi32>
      %cst_18 = arith.constant 0.000000e+00 : f32
      %25 = vector.broadcast %cst_18 : f32 to vector<8x128xf32>
      %26 = arith.select %24, %21, %25 : vector<8x128xi1>, vector<8x128xf32>
      %cst_19 = arith.constant dense<0.000000e+00> : vector<8xf32>
      %27 = vector.multi_reduction <add>, %26, %cst_19 [1] : vector<8x128xf32> to vector<8xf32>
      %28 = vector.shape_cast %27 : vector<8xf32> to vector<8x1xf32>
      %29 = arith.negf %28 : vector<8x1xf32>
      %30 = math.exp %29 : vector<8x1xf32>
      %cst_20 = arith.constant 1.000000e+00 : f32
      %31 = vector.broadcast %cst_20 : f32 to vector<8x1xf32>
      %32 = arith.addf %31, %30 : vector<8x1xf32>
      %33 = arith.divf %31, %32 : vector<8x1xf32>
      %c0_21 = arith.constant 0 : index
      %c0_22 = arith.constant 0 : index
      %34 = vector.load %arg7[%c0_21, %c0_22] : memref<1x128xf32, #tpu.memory_space<vmem>>, vector<1x128xf32>
      %35 = vector.broadcast %33 : vector<8x1xf32> to vector<8x128xf32>
      %36 = vector.broadcast %34 : vector<1x128xf32> to vector<8x128xf32>
      %37 = arith.mulf %35, %36 : vector<8x128xf32>
      %cst_23 = arith.constant 1.000000e+00 : f32
      %38 = vector.broadcast %cst_23 : f32 to vector<8x128xf32>
      %39 = arith.addf %38, %37 : vector<8x128xf32>
      %40 = arith.mulf %39, %21 : vector<8x128xf32>
      %c0_24 = arith.constant 0 : index
      %c0_25 = arith.constant 0 : index
      %41 = vector.load %arg8[%c0_24, %c0_25] : memref<1x128xf32, #tpu.memory_space<vmem>>, vector<1x128xf32>
      %42 = vector.broadcast %33 : vector<8x1xf32> to vector<8x128xf32>
      %43 = vector.broadcast %41 : vector<1x128xf32> to vector<8x128xf32>
      %44 = arith.mulf %42, %43 : vector<8x128xf32>
      %45 = arith.addf %40, %44 : vector<8x128xf32>
      %c0_26 = arith.constant 0 : index
      %c0_27 = arith.constant 0 : index
      %46 = vector.load %arg9[%c0_26, %c0_27] : memref<8x128xf32, #tpu.memory_space<vmem>>, vector<8x128xf32>
      tpu.vector_store %arg9[%c0_26, %c0_27], %45 {strides = array<i32>} : memref<8x128xf32, #tpu.memory_space<vmem>>, vector<8x128xf32>,
    } else {
    }
    return
  }
  func.func @transform_0(%arg0: i32, %arg1: i32) -> (i32, i32) {
    %c0_i32 = arith.constant 0 : i32
    return %arg0, %arg1 : i32, i32
  }
  func.func @transform_1(%arg0: i32, %arg1: i32) -> (i32, i32) {
    %c0_i32 = arith.constant 0 : i32
    %c0_i32_0 = arith.constant 0 : i32
    return %arg1, %c0_i32 : i32, i32
  }
  func.func @transform_2(%arg0: i32, %arg1: i32) -> (i32, i32) {
    %c0_i32 = arith.constant 0 : i32
    %c0_i32_0 = arith.constant 0 : i32
    %c0_i32_1 = arith.constant 0 : i32
    return %c0_i32, %c0_i32_0 : i32, i32
  }
  func.func @transform_3(%arg0: i32, %arg1: i32) -> (i32, i32) {
    %c0_i32 = arith.constant 0 : i32
    %c0_i32_0 = arith.constant 0 : i32
    %c0_i32_1 = arith.constant 0 : i32
    return %c0_i32, %c0_i32_0 : i32, i32
  }
  func.func @transform_4(%arg0: i32, %arg1: i32) -> (i32, i32) {
    %c0_i32 = arith.constant 0 : i32
    %c0_i32_0 = arith.constant 0 : i32
    %c0_i32_1 = arith.constant 0 : i32
    return %c0_i32, %c0_i32_0 : i32, i32
  }
  func.func @transform_5(%arg0: i32, %arg1: i32) -> (i32, i32) {
    %c0_i32 = arith.constant 0 : i32
    %c0_i32_0 = arith.constant 0 : i32
    %c0_i32_1 = arith.constant 0 : i32
    return %c0_i32, %c0_i32_0 : i32, i32
  }
  func.func @transform_6(%arg0: i32, %arg1: i32) -> (i32, i32) {
    %c0_i32 = arith.constant 0 : i32
    %c0_i32_0 = arith.constant 0 : i32
    %c0_i32_1 = arith.constant 0 : i32
    return %c0_i32, %c0_i32_0 : i32, i32
  }
  func.func @transform_7(%arg0: i32, %arg1: i32) -> (i32, i32) {
    %c0_i32 = arith.constant 0 : i32
    %c0_i32_0 = arith.constant 0 : i32
    return %arg0, %c0_i32 : i32, i32
  }
}

</mosaic_0001>

<bundles_post_ra>
// kernel: disalign_forward.1
= control target key start
LH: loop header
LB: loop body
LE: loop exit
PB: predicated region body
PF: predicated region fallthrough
CT: control target
= control target key end

     0   :  { %s1199_s24 = smov 0   ;;  %s1201_s25 = smov 0   ;;  %s1315_s0 = inlined_call_operand.vmem [shape: bf16[8,1024], index: 0, kind: input, shape index: {}]   ;;  %s1316_s1 = inlined_call_operand.vmem [shape: bf16[1024,128], index: 1, kind: input, shape index: {}]   ;;  %s1317_s2 = inlined_call_operand.vmem [shape: f32[1,128], index: 2, kind: input, shape index: {}]   ;;  %s1318_s3 = inlined_call_operand.vmem [shape: bf16[128,128], index: 3, kind: input, shape index: {}]   ;;  %s1319_s4 = inlined_call_operand.vmem [shape: f32[1,128], index: 4, kind: input, shape index: {}]   ;;  %s1320_s5 = inlined_call_operand.vmem [shape: f32[1,128], index: 5, kind: input, shape index: {}]   ;;  %s1321_s6 = inlined_call_operand.vmem [shape: f32[1,128], index: 6, kind: input, shape index: {}]   ;;  %s1322_s7 = inlined_call_operand.vmem [shape: f32[8,128], index: 7, kind: output, shape index: {}]  }
   0x1   :  { %s1203_s26 = smov 0  }
   0x2 LB: > { %s26_s27 = sadd.s32 1, %s1150_s25  ;;  %p925_p0 = scmp.ge.s32.totalorder %s1154_s26, 1  ;;  %s1154_s26 = sphi %s1203_s26, %s17_s26   ;;  %s1150_s25 = sphi %s1201_s25, %s1324_s25   ;;  %s1146_s24 = sphi %s1199_s24, %s1323_s24  }
   0x3   : > { %p27_p1 = scmp.ge.s32.totalorder %s26_s27, 2  ;;  %p267_p2 = scmp.lt.s32.totalorder %s1154_s26, 3 }
   0x5   : > { %s1326_s27 = smov (%p27_p1, %s26_s27), 0  ;;  %p268_p3 = pnand %p925_p0, %p267_p2 }
   0x6   : > { %s926_s28 = sshll.u32 (!%p268_p3), %s1146_s24, 2  ;;  %s928_s29 = sshll.u32 (!%p268_p3), %s1146_s24, 6 }
   0x7   : > { %271 = sbr.rel (%p268_p3) target bundleno = 682 (0x2aa), region = 48  ;;  %p310_p4 = scmp.lt.s32.totalorder (!%p268_p3), %s926_s28, 7 }
   0x8   : > { %p318_p5 = scmp.lt.s32.totalorder (!%p268_p3), %s928_s29, 127  ;;  %p930_p6 = scmp.ne.s32.totalorder (!%p268_p3), %s1146_s24, 0 }
   0xe   : > { %s1328_s28 = smov (!%p310_p4, %s926_s28), 7  ;;  %s1330_s29 = smov (!%p318_p5, %s928_s29), 127 }
   0xf   : > { %s927_s30 = sshll.u32 %s1328_s28, 2  ;;  %s929_s11 = sshll.u32 %s1330_s29, 2  ;;  %v1156_v0 = vmov (!%p930_p6), 0.0  }
  0x10   : > { %s1224_s10 = scalar_lea.vmem %s1315_s0, %s927_s30  ;;  %s1229_s14 = scalar_lea.vmem %s1316_s1, %s929_s11  ;;  %332 = vst [vmem:[#allocation2] sm:$0xff] (!%p930_p6), %v1156_v0 }
  0x11   : > { %331 = sbr.rel (%p930_p6) target bundleno = 24 (0x18), region = 52 }
  0x18 PF: > { %v1084_v1 = vld [vmem:[%s1229_s14 + $0x40] sm:$0xff]   ;;  %v1088_v5 = vld [vmem:[%s1229_s14 + $0x48] sm:$0xff]   ;;  %v1092_v9 = vld [vmem:[%s1229_s14 + $0x50] sm:$0xff]   ;;  %p967_p7 = scmp.ne.s32.totalorder %s1146_s24, 1 }
  0x19   : > { %v1085_v2 = vld [vmem:[%s1229_s14 + $0xc0] sm:$0xff]   ;;  %984 = vmatprep.subr.bf16.mxu0 %v1084_v1  ;;  %v1089_v6 = vld [vmem:[%s1229_s14 + $0xc8] sm:$0xff]   ;;  %v1093_v10 = vld [vmem:[%s1229_s14 + $0xd0] sm:$0xff]   ;;  %v1157_v53 = vmov (!%p967_p7), 0.0   ;;  %vm1158_vm0 = vmmov (!%p967_p7), 0   ;;  %v813_v1 = vlaneseq (!%p967_p7) }
  0x1a   : > { %v1086_v3 = vld [vmem:[%s1229_s14] sm:$0xff]   ;;  %1006 = vmatprep.subr.bf16.mxu1 %v1085_v2  ;;  %v1090_v7 = vld [vmem:[%s1229_s14 + $0x8] sm:$0xff]   ;;  %v1094_v11 = vld [vmem:[%s1229_s14 + $0x10] sm:$0xff]  }
  0x1b   : > { %v1087_v4 = vld [vmem:[%s1229_s14 + $0x80] sm:$0xff]   ;;  %985 = vmatpush3.bf16.msra.mxu0 %v1086_v3  ;;  %v1091_v8 = vld [vmem:[%s1229_s14 + $0x88] sm:$0xff]   ;;  %v1095_v12 = vld [vmem:[%s1229_s14 + $0x90] sm:$0xff]   ;;  %v814_v2 = vand.u32 (!%p967_p7), 127, %v813_v1 }
  0x1c   : > { %1007 = vmatpush3.bf16.msra.mxu1 %v1087_v4  ;;  %986 = vmatprep.subr.bf16.mxu0 %v1088_v5  ;;  %v1096_v13 = vld [vmem:[%s1229_s14 + $0x58] sm:$0xff]   ;;  %v1100_v17 = vld [vmem:[%s1229_s14 + $0x60] sm:$0xff]   ;;  %v1104_v21 = vld [vmem:[%s1229_s14 + $0x68] sm:$0xff]  }
  0x1d   : > { %1008 = vmatprep.subr.bf16.mxu1 %v1089_v6  ;;  %v1097_v14 = vld [vmem:[%s1229_s14 + $0xd8] sm:$0xff]   ;;  %v1101_v18 = vld [vmem:[%s1229_s14 + $0xe0] sm:$0xff]   ;;  %v1105_v22 = vld [vmem:[%s1229_s14 + $0xe8] sm:$0xff]   ;;  %vm815_vm1 = vcmp.eq.s32.totalorder (!%p967_p7), %v814_v2, 10 }
  0x1e   : > { %v1098_v15 = vld [vmem:[%s1229_s14 + $0x18] sm:$0xff]   ;;  %v1102_v19 = vld [vmem:[%s1229_s14 + $0x20] sm:$0xff]   ;;  %v1106_v23 = vld [vmem:[%s1229_s14 + $0x28] sm:$0xff]  }
  0x1f   : > { %987 = vmatpush3.bf16.msra.mxu0 %v1090_v7  ;;  %v1099_v16 = vld [vmem:[%s1229_s14 + $0x98] sm:$0xff]   ;;  %v1103_v20 = vld [vmem:[%s1229_s14 + $0xa0] sm:$0xff]   ;;  %v1107_v24 = vld [vmem:[%s1229_s14 + $0xa8] sm:$0xff]  }
  0x20   : > { %1009 = vmatpush3.bf16.msra.mxu1 %v1091_v8  ;;  %988 = vmatprep.subr.bf16.mxu0 %v1092_v9  ;;  %v1108_v25 = vld [vmem:[%s1229_s14 + $0x70] sm:$0xff]   ;;  %v1112_v29 = vld [vmem:[%s1229_s14 + $0x78] sm:$0xff]   ;;  %v334_v33 = vld [vmem:[%s1224_s10] sm:$0xff] }
  0x21   : > { %1010 = vmatprep.subr.bf16.mxu1 %v1093_v10  ;;  %v1109_v26 = vld [vmem:[%s1229_s14 + $0xf0] sm:$0xff]   ;;  %v1113_v30 = vld [vmem:[%s1229_s14 + $0xf8] sm:$0xff]   ;;  %v335_v34 = vld [vmem:[%s1224_s10 + $0x8] sm:$0xff]  ;;  %v931_v35 = vcombine.low %v334_v33, %v334_v33  ;;  %v932_v36 = vcombine.high %v334_v33, %v334_v33 }
  0x22   : > { %v1110_v27 = vld [vmem:[%s1229_s14 + $0x30] sm:$0xff]   ;;  %v1114_v31 = vld [vmem:[%s1229_s14 + $0x38] sm:$0xff]   ;;  %v933_v37 = vcombine.low %v335_v34, %v335_v34  ;;  %v934_v38 = vcombine.high %v335_v34, %v335_v34  ;;  %v333_v47 = vld [vmem:[#allocation2] sm:$0xff] }
  0x23   : > { %989 = vmatpush3.bf16.msra.mxu0 %v1094_v11  ;;  %v1111_v28 = vld [vmem:[%s1229_s14 + $0xb0] sm:$0xff]   ;;  %v1115_v32 = vld [vmem:[%s1229_s14 + $0xb8] sm:$0xff]   ;;  %638 = vmatprep.mubr.bf16.mxu0 %v932_v36  ;;  %v1120_v52 = vld [vmem:[%s1318_s3] sm:$0xff] (!%p967_p7)  }
  0x24   : > { %1011 = vmatpush3.bf16.msra.mxu1 %v1095_v12  ;;  %990 = vmatprep.subr.bf16.mxu0 %v1096_v13  ;;  %v1121_v54 = vld [vmem:[%s1318_s3 + $0x8] sm:$0xff] (!%p967_p7)   ;;  %v1122_v55 = vld [vmem:[%s1318_s3 + $0x10] sm:$0xff] (!%p967_p7)   ;;  %v1123_v56 = vld [vmem:[%s1318_s3 + $0x18] sm:$0xff] (!%p967_p7)  }
  0x25   : > { %1012 = vmatprep.subr.bf16.mxu1 %v1097_v14  ;;  %678 = vmatprep.mubr.bf16.mxu1 %v934_v38  ;;  %v1124_v57 = vld [vmem:[%s1318_s3 + $0x20] sm:$0xff] (!%p967_p7)   ;;  %v1125_v58 = vld [vmem:[%s1318_s3 + $0x28] sm:$0xff] (!%p967_p7)   ;;  %v1126_v59 = vld [vmem:[%s1318_s3 + $0x30] sm:$0xff] (!%p967_p7)  }
  0x26   : > { %v968_v61 = vld [vmem:[%s1317_s2] ss:$0 sm:$0xff] (!%p967_p7)  ;;  %v1127_v63 = vld [vmem:[%s1318_s3 + $0x38] sm:$0xff] (!%p967_p7)  }
  0x27   : > { %991 = vmatpush3.bf16.msra.mxu0 %v1098_v15  ;;  %v969_v3 = vld [vmem:[%s1319_s4] ss:$0 sm:$0xff] (!%p967_p7) }
  0x28   : > { %1013 = vmatpush3.bf16.msra.mxu1 %v1099_v16  ;;  %992 = vmatprep.subr.bf16.mxu0 %v1100_v17  ;;  %v979_v14 = vld [vmem:[%s1320_s5] ss:$0 sm:$0xff] (!%p967_p7) }
  0x29   : > { %1014 = vmatprep.subr.bf16.mxu1 %v1101_v18  ;;  %v980_v17 = vld [vmem:[%s1321_s6] ss:$0 sm:$0xff] (!%p967_p7) }
  0x2b   : > { %993 = vmatpush3.bf16.msra.mxu0 %v1102_v19 }
  0x2c   : > { %1015 = vmatpush3.bf16.msra.mxu1 %v1103_v20  ;;  %994 = vmatprep.subr.bf16.mxu0 %v1104_v21 }
  0x2d   : > { %1016 = vmatprep.subr.bf16.mxu1 %v1105_v22 }
  0x2f   : > { %995 = vmatpush3.bf16.msra.mxu0 %v1106_v23 }
  0x30   : > { %1017 = vmatpush3.bf16.msra.mxu1 %v1107_v24  ;;  %996 = vmatprep.subr.bf16.mxu0 %v1108_v25 }
  0x31   : > { %1018 = vmatprep.subr.bf16.mxu1 %v1109_v26 }
  0x33   : > { %997 = vmatpush3.bf16.msra.mxu0 %v1110_v27 }
  0x34   : > { %1019 = vmatpush3.bf16.msra.mxu1 %v1111_v28  ;;  %998 = vmatprep.subr.bf16.mxu0 %v1112_v29 }
  0x35   : > { %1020 = vmatprep.subr.bf16.mxu1 %v1113_v30 }
  0x37   : > { %999 = vmatpush3.bf16.msra.mxu0 %v1114_v31 }
  0x38   : > { %1021 = vmatpush3.bf16.msra.mxu1 %v1115_v32  ;;  %1037 = vmatprep.subr.bf16.mxu0 (!%p967_p7), %v1157_v53 }
  0x3a   : > { %639 = vmatmul.mubr.bf16.vlgmr.msra.gmra.mrb[0].mxu0 %v931_v35 }
  0x3b   : > { %679 = vmatmul.mubr.bf16.vlgmr.msra.gmra.mrb[0].mxu1 %v933_v37  ;;  %1038 = vmatpush3.bf16.msra.mxu0 (!%p967_p7), %v1120_v52 }
  0x3c   : > { %1053 = vmatprep.mubr.msk.bf16.mxu0 (!%p967_p7), %vm1158_vm0, %v1157_v53  ;;  %1039 = vmatprep.subr.bf16.mxu0 (!%p967_p7), %v1157_v53 }
  0x3f   : > { %1040 = vmatpush3.bf16.msra.mxu0 (!%p967_p7), %v1121_v54 }
  0x40   : > { %1041 = vmatprep.subr.bf16.mxu0 (!%p967_p7), %v1157_v53 }
  0x43   : > { %1042 = vmatpush3.bf16.msra.mxu0 (!%p967_p7), %v1122_v55 }
  0x44   : > { %1043 = vmatprep.subr.bf16.mxu0 (!%p967_p7), %v1157_v53 }
  0x47   : > { %1044 = vmatpush3.bf16.msra.mxu0 (!%p967_p7), %v1123_v56 }
  0x48   : > { %1045 = vmatprep.subr.bf16.mxu0 (!%p967_p7), %v1157_v53 }
  0x4b   : > { %1046 = vmatpush3.bf16.msra.mxu0 (!%p967_p7), %v1124_v57 }
  0x4c   : > { %1047 = vmatprep.subr.bf16.mxu0 (!%p967_p7), %v1157_v53 }
  0x4f   : > { %1048 = vmatpush3.bf16.msra.mxu0 (!%p967_p7), %v1125_v58 }
  0x50   : > { %1049 = vmatprep.subr.bf16.mxu0 (!%p967_p7), %v1157_v53 }
  0x53   : > { %1050 = vmatpush3.bf16.msra.mxu0 (!%p967_p7), %v1126_v59 }
  0x54   : > { %1051 = vmatprep.subr.bf16.mxu0 (!%p967_p7), %v1157_v53 }
  0x57   : > { %1052 = vmatpush3.bf16.msra.mxu0 (!%p967_p7), %v1127_v63 }
 0x10d   : > { %v1000_v39 = vpop.f32.mrb[0].mxu0 }
 0x10e   : > { %v1022_v40 = vpop.f32.mrb[0].mxu1  ;;  %v1001_v41 = vpop.f32.mrb[1].mxu0 }
 0x10f   : > { %v1023_v42 = vpop.f32.mrb[1].mxu1  ;;  %v1002_v43 = vadd.f32 %v1001_v41, %v1000_v39  ;;  %v1003_v45 = vpop.f32.mrb[2].mxu0 }
 0x110   : > { %v1024_v44 = vadd.f32 %v1023_v42, %v1022_v40  ;;  %v1025_v46 = vpop.f32.mrb[2].mxu1  ;;  %v1004_v48 = vpop.f32.mrb[3].mxu0  ;;  %691 = sbr.rel (%p967_p7) target bundleno = 682 (0x2aa), region = 56 }
 0x111   : > { %v1026_v49 = vpop.f32.mrb[3].mxu1 }
 0x112   : > { %v681_v50 = vadd.f32 %v1024_v44, %v1002_v43 }
 0x114   : > { %v686_v51 = vadd.f32 %v681_v50, %v333_v47 }
 0x116   : > { %687 = vst [vmem:[#allocation2] sm:$0xff] %v686_v51 }
 0x11d   : > { %v692_v60 = vld [vmem:[#allocation2] sm:$0xff] }
 0x11e   : > { %v700_v62 = vadd.f32 %v968_v61, %v692_v60 }
 0x120   : > { %v701_v0 = vpack.c.bf16 %v700_v62, %v700_v62 }
 0x122   : > { %1054 = vmatmul.mubr.bf16.vlgmr.msra.gmra.mrb[0].mxu0 %v701_v0 }
 0x1f5   : > { %v807_v4 = vpop.f32.mrb[0].mxu0 }
 0x1f6   : > { %v808_v5 = vadd.f32 %v969_v3, %v807_v4  ;;  %v1055_v6 = vpop.f32.mrb[1].mxu0 }
 0x1f7   : > { %v810_v7 = vpop.f32.mrb[2].mxu0 }
 0x1f8   : > { %v1056_v8 = vpop.f32.mrb[3].mxu0  ;;  %v816_v9 = vsel %vm815_vm1, %v808_v5, 0.0 }
 0x1f9   : > { %817 = vadd.xlane.f32.xlu0 %v816_v9 }
 0x286   : > { %v818_v10 = vpop.xlane.xlu0 %817 }
 0x287   : > { %v978_v11 = vmul.f32 -1.442695, %v818_v10 }
 0x289   : > { %1128 = vpow2.f32 %v978_v11 }
 0x293   : > { %v1129_v12 = vpop.eup %1128 }
 0x294   : > { %v822_v13 = vadd.f32 1.0, %v1129_v12 }
 0x296   : > { %1130 = vrcp.f32 %v822_v13 }
 0x2a0   : > { %v1131_v15 = vpop.eup %1130 }
 0x2a1   : > { %v832_v16 = vmul.f32 %v1131_v15, %v979_v14  ;;  %v842_v20 = vmul.f32 %v1131_v15, %v980_v17 }
 0x2a3   : > { %v833_v18 = vadd.f32 1.0, %v832_v16 }
 0x2a5   : > { %v834_v19 = vmul.f32 %v833_v18, %v808_v5 }
 0x2a7   : > { %v843_v21 = vadd.f32 %v842_v20, %v834_v19 }
 0x2a9   : > { %844 = vst [vmem:[%s1322_s7] sm:$0xff] %v843_v21 }
 0x2aa PF: > { %s17_s26 = sadd.s32 1, %s1154_s26   ;;  %s1323_s24 = smov %s1150_s25 }
 0x2ab   : > { %p14_p8 = scmp.ge.s32.totalorder %s17_s26, 4   ;;  %s1324_s25 = smov %s1326_s27 }
 0x2ad   :  { %16 = sbr.rel (!%p14_p8) target bundleno = 2 (0x2), region = 89 }

</bundles_post_ra>
